<compile_context>
chip_gen: v7x
topology: tpu7x:2x2x1
jax: 0.10.0
libtpu: 0.0.40
codegen_flags: <defaults>
</compile_context>

<pallas_src>
import jax
import jax.numpy as jnp
from jax.experimental import pallas as pl
from jax.experimental.pallas import tpu as pltpu


def _add_kernel(a_ref, b_ref, o_ref):
    # Whole-tile VPU add; tiles are already resident in VMEM.
    o_ref[...] = a_ref[...] + b_ref[...]


_LANES = 128
_SMALL_BYTES = 2 * 1024 * 1024   # <= this per operand: gridless, whole-array VMEM blocks
_BLOCK_ROWS = 1024               # scaling path: (1024, 128) f32 = 512 KiB per operand block


def pallas_add(a, b):
    assert a.shape == b.shape and a.dtype == b.dtype
    orig_shape = a.shape
    n = a.size

    # TODO(synk): for best end-to-end perf this add should be fused into its
    # producing conv/matmul (or left to XLA fusion); standalone it is launch-
    # overhead bound at this size.  Kept as a Pallas kernel per request.
    if n % _LANES != 0:
        # Non-lane-aligned sizes: let XLA fuse a plain add instead of paying
        # two extra HBM passes for pad/slice round-trips.
        return a + b

    rows = n // _LANES
    a2 = a.reshape(rows, _LANES)
    b2 = b.reshape(rows, _LANES)

    cost = pl.CostEstimate(
        flops=n,
        bytes_accessed=3 * n * a.dtype.itemsize,
        transcendentals=0,
    )

    if n * a.dtype.itemsize <= _SMALL_BYTES:
        # Gridless: both operands + output fit trivially in VMEM (3 x 245 KiB
        # here).  No grid steps, no double-buffer allocation, one full-tile add.
        out2 = pl.pallas_call(
            _add_kernel,
            out_shape=jax.ShapeDtypeStruct((rows, _LANES), a.dtype),
            in_specs=[
                pl.BlockSpec(memory_space=pltpu.MemorySpace.VMEM),
                pl.BlockSpec(memory_space=pltpu.MemorySpace.VMEM),
            ],
            out_specs=pl.BlockSpec(memory_space=pltpu.MemorySpace.VMEM),
            cost_estimate=cost,
        )(a2, b2)
    else:
        # Scaling path (only if this helper is reused on multi-MiB tensors):
        # 1D grid over rows, ~512 KiB f32 blocks, default double buffering,
        # parallel semantics so megacore chips can shard the grid axis.
        spec = pl.BlockSpec((_BLOCK_ROWS, _LANES), lambda i: (i, 0))
        out2 = pl.pallas_call(
            _add_kernel,
            out_shape=jax.ShapeDtypeStruct((rows, _LANES), a.dtype),
            grid=(pl.cdiv(rows, _BLOCK_ROWS),),
            in_specs=[spec, spec],
            out_specs=spec,
            compiler_params=pltpu.CompilerParams(
                dimension_semantics=("parallel",)),
            cost_estimate=cost,
        )(a2, b2)

    return out2.reshape(orig_shape)


if __name__ == "__main__":
    key = jax.random.PRNGKey(0)
    k1, k2 = jax.random.split(key)
    # Shapes from the PyTorch module: (1, 80, 28, 28) NCHW float32.
    x272 = jax.random.normal(k1, (1, 80, 28, 28), dtype=jnp.float32)
    x257 = jax.random.normal(k2, (1, 80, 28, 28), dtype=jnp.float32)

    add_fn = jax.jit(pallas_add)
    out = add_fn(x272, x257)
    jax.block_until_ready(out)

    ref = x272 + x257
    assert out.shape == ref.shape and out.dtype == ref.dtype
    assert jnp.allclose(out, ref, atol=1e-6, rtol=1e-6)

    print("KERNEL_OK")
</pallas_src>

<mosaic_0001>
module attributes {stable_mosaic.version = 11 : i64} {
  func.func @_add_kernel(%arg0: memref<490x128xf32, #tpu.memory_space<vmem>>, %arg1: memref<490x128xf32, #tpu.memory_space<vmem>>, %arg2: memref<490x128xf32, #tpu.memory_space<vmem>>) attributes {dimension_semantics = [], scalar_prefetch = 0 : i64, scratch_operands = 0 : i64, tpu.core_type = #tpu.core_type<tc>} {
    %c0 = arith.constant 0 : index
    %c0_0 = arith.constant 0 : index
    %0 = vector.load %arg0[%c0, %c0_0] : memref<490x128xf32, #tpu.memory_space<vmem>>, vector<490x128xf32>
    %c0_1 = arith.constant 0 : index
    %c0_2 = arith.constant 0 : index
    %1 = vector.load %arg1[%c0_1, %c0_2] : memref<490x128xf32, #tpu.memory_space<vmem>>, vector<490x128xf32>
    %2 = arith.addf %0, %1 : vector<490x128xf32>
    %c0_3 = arith.constant 0 : index
    %c0_4 = arith.constant 0 : index
    %3 = vector.load %arg2[%c0_3, %c0_4] : memref<490x128xf32, #tpu.memory_space<vmem>>, vector<490x128xf32>
    tpu.vector_store %arg2[%c0_3, %c0_4], %2 {strides = array<i32>} : memref<490x128xf32, #tpu.memory_space<vmem>>, vector<490x128xf32>,
    return
  }
}

</mosaic_0001>

<bundles_post_ra>
// kernel: pallas_add.1
= control target key start
LH: loop header
LB: loop body
LE: loop exit
PB: predicated region body
PF: predicated region fallthrough
CT: control target
= control target key end

     0   :  { %s836_s0 = inlined_call_operand.vmem [shape: f32[490,128], index: 0, kind: input, shape index: {}]   ;;  %s837_s1 = inlined_call_operand.vmem [shape: f32[490,128], index: 1, kind: input, shape index: {}]   ;;  %s838_s2 = inlined_call_operand.vmem [shape: f32[490,128], index: 2, kind: output, shape index: {}]  }
   0x1   :  { %v11_v0 = vld [vmem:[%s836_s0] sm:$0xff]  ;;  %v12_v2 = vld [vmem:[%s836_s0 + $0x8] sm:$0xff]  ;;  %v13_v5 = vld [vmem:[%s836_s0 + $0x10] sm:$0xff] }
   0x2   :  { %v73_v1 = vld [vmem:[%s837_s1] sm:$0xff]  ;;  %v74_v4 = vld [vmem:[%s837_s1 + $0x8] sm:$0xff]  ;;  %v75_v6 = vld [vmem:[%s837_s1 + $0x10] sm:$0xff] }
   0x3   :  { %v135_v3 = vadd.f32 %v73_v1, %v11_v0  ;;  %v136_v7 = vadd.f32 %v74_v4, %v12_v2  ;;  %v137_v8 = vadd.f32 %v75_v6, %v13_v5  ;;  %v14_v9 = vld [vmem:[%s836_s0 + $0x18] sm:$0xff]  ;;  %v15_v11 = vld [vmem:[%s836_s0 + $0x20] sm:$0xff]  ;;  %v16_v14 = vld [vmem:[%s836_s0 + $0x28] sm:$0xff] }
   0x4   :  { %v76_v10 = vld [vmem:[%s837_s1 + $0x18] sm:$0xff]  ;;  %v77_v13 = vld [vmem:[%s837_s1 + $0x20] sm:$0xff]  ;;  %v78_v15 = vld [vmem:[%s837_s1 + $0x28] sm:$0xff] }
   0x5   :  { %197 = vst [vmem:[%s838_s2] sm:$0xff] %v135_v3  ;;  %v138_v12 = vadd.f32 %v76_v10, %v14_v9  ;;  %198 = vst [vmem:[%s838_s2 + $0x8] sm:$0xff] %v136_v7  ;;  %v139_v16 = vadd.f32 %v77_v13, %v15_v11  ;;  %v140_v17 = vadd.f32 %v78_v15, %v16_v14  ;;  %v17_v18 = vld [vmem:[%s836_s0 + $0x30] sm:$0xff]  ;;  %v18_v20 = vld [vmem:[%s836_s0 + $0x38] sm:$0xff] }
   0x6   :  { %199 = vst [vmem:[%s838_s2 + $0x10] sm:$0xff] %v137_v8  ;;  %v79_v19 = vld [vmem:[%s837_s1 + $0x30] sm:$0xff]  ;;  %v80_v22 = vld [vmem:[%s837_s1 + $0x38] sm:$0xff]  ;;  %v19_v23 = vld [vmem:[%s836_s0 + $0x40] sm:$0xff] }
   0x7   :  { %200 = vst [vmem:[%s838_s2 + $0x18] sm:$0xff] %v138_v12  ;;  %v141_v21 = vadd.f32 %v79_v19, %v17_v18  ;;  %v81_v24 = vld [vmem:[%s837_s1 + $0x40] sm:$0xff]  ;;  %201 = vst [vmem:[%s838_s2 + $0x20] sm:$0xff] %v139_v16  ;;  %v142_v25 = vadd.f32 %v80_v22, %v18_v20  ;;  %v20_v27 = vld [vmem:[%s836_s0 + $0x48] sm:$0xff] }
   0x8   :  { %202 = vst [vmem:[%s838_s2 + $0x28] sm:$0xff] %v140_v17  ;;  %v143_v26 = vadd.f32 %v81_v24, %v19_v23  ;;  %v82_v28 = vld [vmem:[%s837_s1 + $0x48] sm:$0xff]  ;;  %v21_v29 = vld [vmem:[%s836_s0 + $0x50] sm:$0xff]  ;;  %v22_v32 = vld [vmem:[%s836_s0 + $0x58] sm:$0xff] }
   0x9   :  { %203 = vst [vmem:[%s838_s2 + $0x30] sm:$0xff] %v141_v21  ;;  %v144_v30 = vadd.f32 %v82_v28, %v20_v27  ;;  %v83_v31 = vld [vmem:[%s837_s1 + $0x50] sm:$0xff]  ;;  %v84_v33 = vld [vmem:[%s837_s1 + $0x58] sm:$0xff]  ;;  %204 = vst [vmem:[%s838_s2 + $0x38] sm:$0xff] %v142_v25 }
   0xa   :  { %205 = vst [vmem:[%s838_s2 + $0x40] sm:$0xff] %v143_v26  ;;  %v145_v34 = vadd.f32 %v83_v31, %v21_v29  ;;  %v146_v35 = vadd.f32 %v84_v33, %v22_v32  ;;  %v23_v36 = vld [vmem:[%s836_s0 + $0x60] sm:$0xff]  ;;  %v24_v38 = vld [vmem:[%s836_s0 + $0x68] sm:$0xff]  ;;  %v25_v41 = vld [vmem:[%s836_s0 + $0x70] sm:$0xff] }
   0xb   :  { %v85_v37 = vld [vmem:[%s837_s1 + $0x60] sm:$0xff]  ;;  %206 = vst [vmem:[%s838_s2 + $0x48] sm:$0xff] %v144_v30  ;;  %v86_v40 = vld [vmem:[%s837_s1 + $0x68] sm:$0xff]  ;;  %v87_v42 = vld [vmem:[%s837_s1 + $0x70] sm:$0xff] }
   0xc   :  { %v147_v39 = vadd.f32 %v85_v37, %v23_v36  ;;  %207 = vst [vmem:[%s838_s2 + $0x50] sm:$0xff] %v145_v34  ;;  %208 = vst [vmem:[%s838_s2 + $0x58] sm:$0xff] %v146_v35  ;;  %v148_v43 = vadd.f32 %v86_v40, %v24_v38  ;;  %v149_v44 = vadd.f32 %v87_v42, %v25_v41  ;;  %v26_v45 = vld [vmem:[%s836_s0 + $0x78] sm:$0xff]  ;;  %v27_v47 = vld [vmem:[%s836_s0 + $0x80] sm:$0xff] }
   0xd   :  { %v88_v46 = vld [vmem:[%s837_s1 + $0x78] sm:$0xff]  ;;  %v89_v49 = vld [vmem:[%s837_s1 + $0x80] sm:$0xff]  ;;  %v28_v50 = vld [vmem:[%s836_s0 + $0x88] sm:$0xff] }
   0xe   :  { %209 = vst [vmem:[%s838_s2 + $0x60] sm:$0xff] %v147_v39  ;;  %v150_v48 = vadd.f32 %v88_v46, %v26_v45  ;;  %v90_v51 = vld [vmem:[%s837_s1 + $0x88] sm:$0xff]  ;;  %210 = vst [vmem:[%s838_s2 + $0x68] sm:$0xff] %v148_v43  ;;  %v151_v52 = vadd.f32 %v89_v49, %v27_v47  ;;  %v29_v54 = vld [vmem:[%s836_s0 + $0x90] sm:$0xff] }
   0xf   :  { %211 = vst [vmem:[%s838_s2 + $0x70] sm:$0xff] %v149_v44  ;;  %v152_v53 = vadd.f32 %v90_v51, %v28_v50  ;;  %v91_v55 = vld [vmem:[%s837_s1 + $0x90] sm:$0xff]  ;;  %v30_v56 = vld [vmem:[%s836_s0 + $0x98] sm:$0xff]  ;;  %v31_v59 = vld [vmem:[%s836_s0 + $0xa0] sm:$0xff] }
  0x10   :  { %212 = vst [vmem:[%s838_s2 + $0x78] sm:$0xff] %v150_v48  ;;  %v153_v57 = vadd.f32 %v91_v55, %v29_v54  ;;  %v92_v58 = vld [vmem:[%s837_s1 + $0x98] sm:$0xff]  ;;  %v93_v60 = vld [vmem:[%s837_s1 + $0xa0] sm:$0xff]  ;;  %213 = vst [vmem:[%s838_s2 + $0x80] sm:$0xff] %v151_v52 }
  0x11   :  { %214 = vst [vmem:[%s838_s2 + $0x88] sm:$0xff] %v152_v53  ;;  %v154_v61 = vadd.f32 %v92_v58, %v30_v56  ;;  %v155_v62 = vadd.f32 %v93_v60, %v31_v59  ;;  %v32_v63 = vld [vmem:[%s836_s0 + $0xa8] sm:$0xff]  ;;  %v33_v1 = vld [vmem:[%s836_s0 + $0xb0] sm:$0xff]  ;;  %v34_v4 = vld [vmem:[%s836_s0 + $0xb8] sm:$0xff] }
  0x12   :  { %v94_v0 = vld [vmem:[%s837_s1 + $0xa8] sm:$0xff]  ;;  %215 = vst [vmem:[%s838_s2 + $0x90] sm:$0xff] %v153_v57  ;;  %v95_v3 = vld [vmem:[%s837_s1 + $0xb0] sm:$0xff]  ;;  %v96_v5 = vld [vmem:[%s837_s1 + $0xb8] sm:$0xff] }
  0x13   :  { %v156_v2 = vadd.f32 %v94_v0, %v32_v63  ;;  %216 = vst [vmem:[%s838_s2 + $0x98] sm:$0xff] %v154_v61  ;;  %217 = vst [vmem:[%s838_s2 + $0xa0] sm:$0xff] %v155_v62  ;;  %v157_v6 = vadd.f32 %v95_v3, %v33_v1  ;;  %v158_v7 = vadd.f32 %v96_v5, %v34_v4  ;;  %v35_v8 = vld [vmem:[%s836_s0 + $0xc0] sm:$0xff]  ;;  %v36_v10 = vld [vmem:[%s836_s0 + $0xc8] sm:$0xff] }
  0x14   :  { %v97_v9 = vld [vmem:[%s837_s1 + $0xc0] sm:$0xff]  ;;  %v98_v12 = vld [vmem:[%s837_s1 + $0xc8] sm:$0xff]  ;;  %v37_v13 = vld [vmem:[%s836_s0 + $0xd0] sm:$0xff] }
  0x15   :  { %218 = vst [vmem:[%s838_s2 + $0xa8] sm:$0xff] %v156_v2  ;;  %v159_v11 = vadd.f32 %v97_v9, %v35_v8  ;;  %v99_v14 = vld [vmem:[%s837_s1 + $0xd0] sm:$0xff]  ;;  %219 = vst [vmem:[%s838_s2 + $0xb0] sm:$0xff] %v157_v6  ;;  %v160_v15 = vadd.f32 %v98_v12, %v36_v10  ;;  %v38_v17 = vld [vmem:[%s836_s0 + $0xd8] sm:$0xff] }
  0x16   :  { %220 = vst [vmem:[%s838_s2 + $0xb8] sm:$0xff] %v158_v7  ;;  %v161_v16 = vadd.f32 %v99_v14, %v37_v13  ;;  %v100_v18 = vld [vmem:[%s837_s1 + $0xd8] sm:$0xff]  ;;  %v39_v19 = vld [vmem:[%s836_s0 + $0xe0] sm:$0xff]  ;;  %v40_v22 = vld [vmem:[%s836_s0 + $0xe8] sm:$0xff] }
  0x17   :  { %221 = vst [vmem:[%s838_s2 + $0xc0] sm:$0xff] %v159_v11  ;;  %v162_v20 = vadd.f32 %v100_v18, %v38_v17  ;;  %v101_v21 = vld [vmem:[%s837_s1 + $0xe0] sm:$0xff]  ;;  %v102_v23 = vld [vmem:[%s837_s1 + $0xe8] sm:$0xff]  ;;  %222 = vst [vmem:[%s838_s2 + $0xc8] sm:$0xff] %v160_v15 }
  0x18   :  { %223 = vst [vmem:[%s838_s2 + $0xd0] sm:$0xff] %v161_v16  ;;  %v163_v24 = vadd.f32 %v101_v21, %v39_v19  ;;  %v164_v25 = vadd.f32 %v102_v23, %v40_v22  ;;  %v41_v26 = vld [vmem:[%s836_s0 + $0xf0] sm:$0xff]  ;;  %v42_v28 = vld [vmem:[%s836_s0 + $0xf8] sm:$0xff]  ;;  %v43_v31 = vld [vmem:[%s836_s0 + $0x100] sm:$0xff] }
  0x19   :  { %v103_v27 = vld [vmem:[%s837_s1 + $0xf0] sm:$0xff]  ;;  %224 = vst [vmem:[%s838_s2 + $0xd8] sm:$0xff] %v162_v20  ;;  %v104_v30 = vld [vmem:[%s837_s1 + $0xf8] sm:$0xff]  ;;  %v105_v32 = vld [vmem:[%s837_s1 + $0x100] sm:$0xff] }
  0x1a   :  { %v165_v29 = vadd.f32 %v103_v27, %v41_v26  ;;  %225 = vst [vmem:[%s838_s2 + $0xe0] sm:$0xff] %v163_v24  ;;  %226 = vst [vmem:[%s838_s2 + $0xe8] sm:$0xff] %v164_v25  ;;  %v166_v33 = vadd.f32 %v104_v30, %v42_v28  ;;  %v167_v34 = vadd.f32 %v105_v32, %v43_v31  ;;  %v44_v35 = vld [vmem:[%s836_s0 + $0x108] sm:$0xff]  ;;  %v45_v37 = vld [vmem:[%s836_s0 + $0x110] sm:$0xff] }
  0x1b   :  { %v106_v36 = vld [vmem:[%s837_s1 + $0x108] sm:$0xff]  ;;  %v107_v39 = vld [vmem:[%s837_s1 + $0x110] sm:$0xff]  ;;  %v46_v40 = vld [vmem:[%s836_s0 + $0x118] sm:$0xff] }
  0x1c   :  { %227 = vst [vmem:[%s838_s2 + $0xf0] sm:$0xff] %v165_v29  ;;  %v168_v38 = vadd.f32 %v106_v36, %v44_v35  ;;  %v108_v41 = vld [vmem:[%s837_s1 + $0x118] sm:$0xff]  ;;  %228 = vst [vmem:[%s838_s2 + $0xf8] sm:$0xff] %v166_v33  ;;  %v169_v42 = vadd.f32 %v107_v39, %v45_v37  ;;  %v47_v44 = vld [vmem:[%s836_s0 + $0x120] sm:$0xff] }
  0x1d   :  { %229 = vst [vmem:[%s838_s2 + $0x100] sm:$0xff] %v167_v34  ;;  %v170_v43 = vadd.f32 %v108_v41, %v46_v40  ;;  %v109_v45 = vld [vmem:[%s837_s1 + $0x120] sm:$0xff]  ;;  %v48_v46 = vld [vmem:[%s836_s0 + $0x128] sm:$0xff]  ;;  %v49_v49 = vld [vmem:[%s836_s0 + $0x130] sm:$0xff] }
  0x1e   :  { %230 = vst [vmem:[%s838_s2 + $0x108] sm:$0xff] %v168_v38  ;;  %v171_v47 = vadd.f32 %v109_v45, %v47_v44  ;;  %v110_v48 = vld [vmem:[%s837_s1 + $0x128] sm:$0xff]  ;;  %v111_v50 = vld [vmem:[%s837_s1 + $0x130] sm:$0xff]  ;;  %231 = vst [vmem:[%s838_s2 + $0x110] sm:$0xff] %v169_v42 }
  0x1f   :  { %232 = vst [vmem:[%s838_s2 + $0x118] sm:$0xff] %v170_v43  ;;  %v172_v51 = vadd.f32 %v110_v48, %v48_v46  ;;  %v173_v52 = vadd.f32 %v111_v50, %v49_v49  ;;  %v50_v53 = vld [vmem:[%s836_s0 + $0x138] sm:$0xff]  ;;  %v51_v55 = vld [vmem:[%s836_s0 + $0x140] sm:$0xff]  ;;  %v52_v58 = vld [vmem:[%s836_s0 + $0x148] sm:$0xff] }
  0x20   :  { %v112_v54 = vld [vmem:[%s837_s1 + $0x138] sm:$0xff]  ;;  %233 = vst [vmem:[%s838_s2 + $0x120] sm:$0xff] %v171_v47  ;;  %v113_v57 = vld [vmem:[%s837_s1 + $0x140] sm:$0xff]  ;;  %v114_v59 = vld [vmem:[%s837_s1 + $0x148] sm:$0xff] }
  0x21   :  { %v174_v56 = vadd.f32 %v112_v54, %v50_v53  ;;  %234 = vst [vmem:[%s838_s2 + $0x128] sm:$0xff] %v172_v51  ;;  %235 = vst [vmem:[%s838_s2 + $0x130] sm:$0xff] %v173_v52  ;;  %v175_v60 = vadd.f32 %v113_v57, %v51_v55  ;;  %v176_v61 = vadd.f32 %v114_v59, %v52_v58  ;;  %v53_v62 = vld [vmem:[%s836_s0 + $0x150] sm:$0xff]  ;;  %v54_v0 = vld [vmem:[%s836_s0 + $0x158] sm:$0xff] }
  0x22   :  { %v115_v63 = vld [vmem:[%s837_s1 + $0x150] sm:$0xff]  ;;  %v116_v2 = vld [vmem:[%s837_s1 + $0x158] sm:$0xff]  ;;  %v55_v3 = vld [vmem:[%s836_s0 + $0x160] sm:$0xff] }
  0x23   :  { %236 = vst [vmem:[%s838_s2 + $0x138] sm:$0xff] %v174_v56  ;;  %v177_v1 = vadd.f32 %v115_v63, %v53_v62  ;;  %v117_v4 = vld [vmem:[%s837_s1 + $0x160] sm:$0xff]  ;;  %237 = vst [vmem:[%s838_s2 + $0x140] sm:$0xff] %v175_v60  ;;  %v178_v5 = vadd.f32 %v116_v2, %v54_v0  ;;  %v56_v7 = vld [vmem:[%s836_s0 + $0x168] sm:$0xff] }
  0x24   :  { %238 = vst [vmem:[%s838_s2 + $0x148] sm:$0xff] %v176_v61  ;;  %v179_v6 = vadd.f32 %v117_v4, %v55_v3  ;;  %v118_v8 = vld [vmem:[%s837_s1 + $0x168] sm:$0xff]  ;;  %v57_v9 = vld [vmem:[%s836_s0 + $0x170] sm:$0xff]  ;;  %v58_v12 = vld [vmem:[%s836_s0 + $0x178] sm:$0xff] }
  0x25   :  { %239 = vst [vmem:[%s838_s2 + $0x150] sm:$0xff] %v177_v1  ;;  %v180_v10 = vadd.f32 %v118_v8, %v56_v7  ;;  %v119_v11 = vld [vmem:[%s837_s1 + $0x170] sm:$0xff]  ;;  %v120_v13 = vld [vmem:[%s837_s1 + $0x178] sm:$0xff]  ;;  %240 = vst [vmem:[%s838_s2 + $0x158] sm:$0xff] %v178_v5 }
  0x26   :  { %241 = vst [vmem:[%s838_s2 + $0x160] sm:$0xff] %v179_v6  ;;  %v181_v14 = vadd.f32 %v119_v11, %v57_v9  ;;  %v182_v15 = vadd.f32 %v120_v13, %v58_v12  ;;  %v59_v16 = vld [vmem:[%s836_s0 + $0x180] sm:$0xff]  ;;  %v60_v18 = vld [vmem:[%s836_s0 + $0x188] sm:$0xff]  ;;  %v61_v21 = vld [vmem:[%s836_s0 + $0x190] sm:$0xff] }
  0x27   :  { %v121_v17 = vld [vmem:[%s837_s1 + $0x180] sm:$0xff]  ;;  %242 = vst [vmem:[%s838_s2 + $0x168] sm:$0xff] %v180_v10  ;;  %v122_v20 = vld [vmem:[%s837_s1 + $0x188] sm:$0xff]  ;;  %v123_v22 = vld [vmem:[%s837_s1 + $0x190] sm:$0xff] }
  0x28   :  { %v183_v19 = vadd.f32 %v121_v17, %v59_v16  ;;  %243 = vst [vmem:[%s838_s2 + $0x170] sm:$0xff] %v181_v14  ;;  %244 = vst [vmem:[%s838_s2 + $0x178] sm:$0xff] %v182_v15  ;;  %v184_v23 = vadd.f32 %v122_v20, %v60_v18  ;;  %v185_v24 = vadd.f32 %v123_v22, %v61_v21  ;;  %v62_v25 = vld [vmem:[%s836_s0 + $0x198] sm:$0xff]  ;;  %v63_v27 = vld [vmem:[%s836_s0 + $0x1a0] sm:$0xff] }
  0x29   :  { %v124_v26 = vld [vmem:[%s837_s1 + $0x198] sm:$0xff]  ;;  %v125_v29 = vld [vmem:[%s837_s1 + $0x1a0] sm:$0xff]  ;;  %v64_v30 = vld [vmem:[%s836_s0 + $0x1a8] sm:$0xff] }
  0x2a   :  { %245 = vst [vmem:[%s838_s2 + $0x180] sm:$0xff] %v183_v19  ;;  %v186_v28 = vadd.f32 %v124_v26, %v62_v25  ;;  %v126_v31 = vld [vmem:[%s837_s1 + $0x1a8] sm:$0xff]  ;;  %246 = vst [vmem:[%s838_s2 + $0x188] sm:$0xff] %v184_v23  ;;  %v187_v32 = vadd.f32 %v125_v29, %v63_v27  ;;  %v65_v34 = vld [vmem:[%s836_s0 + $0x1b0] sm:$0xff] }
  0x2b   :  { %247 = vst [vmem:[%s838_s2 + $0x190] sm:$0xff] %v185_v24  ;;  %v188_v33 = vadd.f32 %v126_v31, %v64_v30  ;;  %v127_v35 = vld [vmem:[%s837_s1 + $0x1b0] sm:$0xff]  ;;  %v66_v36 = vld [vmem:[%s836_s0 + $0x1b8] sm:$0xff]  ;;  %v67_v39 = vld [vmem:[%s836_s0 + $0x1c0] sm:$0xff] }
  0x2c   :  { %248 = vst [vmem:[%s838_s2 + $0x198] sm:$0xff] %v186_v28  ;;  %v189_v37 = vadd.f32 %v127_v35, %v65_v34  ;;  %v128_v38 = vld [vmem:[%s837_s1 + $0x1b8] sm:$0xff]  ;;  %v129_v40 = vld [vmem:[%s837_s1 + $0x1c0] sm:$0xff]  ;;  %249 = vst [vmem:[%s838_s2 + $0x1a0] sm:$0xff] %v187_v32 }
  0x2d   :  { %250 = vst [vmem:[%s838_s2 + $0x1a8] sm:$0xff] %v188_v33  ;;  %v190_v41 = vadd.f32 %v128_v38, %v66_v36  ;;  %v191_v42 = vadd.f32 %v129_v40, %v67_v39  ;;  %v68_v43 = vld [vmem:[%s836_s0 + $0x1c8] sm:$0xff]  ;;  %v69_v45 = vld [vmem:[%s836_s0 + $0x1d0] sm:$0xff]  ;;  %v70_v48 = vld [vmem:[%s836_s0 + $0x1d8] sm:$0xff] }
  0x2e   :  { %v130_v44 = vld [vmem:[%s837_s1 + $0x1c8] sm:$0xff]  ;;  %251 = vst [vmem:[%s838_s2 + $0x1b0] sm:$0xff] %v189_v37  ;;  %v131_v47 = vld [vmem:[%s837_s1 + $0x1d0] sm:$0xff]  ;;  %v132_v49 = vld [vmem:[%s837_s1 + $0x1d8] sm:$0xff] }
  0x2f   :  { %v192_v46 = vadd.f32 %v130_v44, %v68_v43  ;;  %252 = vst [vmem:[%s838_s2 + $0x1b8] sm:$0xff] %v190_v41  ;;  %253 = vst [vmem:[%s838_s2 + $0x1c0] sm:$0xff] %v191_v42  ;;  %v193_v50 = vadd.f32 %v131_v47, %v69_v45  ;;  %v194_v51 = vadd.f32 %v132_v49, %v70_v48  ;;  %v71_v52 = vld [vmem:[%s836_s0 + $0x1e0] sm:$0xff]  ;;  %v72_v54 = vld [vmem:[%s836_s0 + $0x1e8] sm:$0x3] }
  0x30   :  { %v133_v53 = vld [vmem:[%s837_s1 + $0x1e0] sm:$0xff]  ;;  %v134_v56 = vld [vmem:[%s837_s1 + $0x1e8] sm:$0x3] }
  0x31   :  { %254 = vst [vmem:[%s838_s2 + $0x1c8] sm:$0xff] %v192_v46  ;;  %v195_v55 = vadd.f32 %v133_v53, %v71_v52  ;;  %255 = vst [vmem:[%s838_s2 + $0x1d0] sm:$0xff] %v193_v50  ;;  %v196_v57 = vadd.f32 %v134_v56, %v72_v54 }
  0x32   :  { %256 = vst [vmem:[%s838_s2 + $0x1d8] sm:$0xff] %v194_v51 }
  0x33   :  { %257 = vst [vmem:[%s838_s2 + $0x1e0] sm:$0xff] %v195_v55  ;;  %258 = vst [vmem:[%s838_s2 + $0x1e8] sm:$0x3] %v196_v57 }

</bundles_post_ra>
